<compile_context>
chip_gen: v6e
topology: v6e:2x2x1
jax: 0.10.0
libtpu: 0.0.40
codegen_flags: <defaults>
</compile_context>

<pallas_src>
import functools

import jax
import jax.numpy as jnp
from jax import lax
from jax.experimental import pallas as pl
from jax.experimental.pallas import tpu as pltpu


# ----------------------------------------------------------------------------
# Kernels
# ----------------------------------------------------------------------------
def _channel_attn_fused_kernel(x_ref, w_ref, b_ref, o_ref, *, inv_l):
    """Single-pass kernel: x block is (tb, C, L) with the full L in VMEM."""
    x = x_ref[...]                                           # (tb, C, L)
    s = jnp.sum(x, axis=-1) * inv_l                          # (tb, C) mean over L
    # Folded linear_out(linear_in(s)) = s @ W_comb + b_comb, then tanh.
    t = jnp.tanh(
        jnp.dot(s, w_ref[...], preferred_element_type=jnp.float32) + b_ref[...]
    )                                                        # (tb, C)
    # Softmax over the channel dim (exact denominator).
    t = t - jnp.max(t, axis=-1, keepdims=True)
    e = jnp.exp(t)
    attn = e / jnp.sum(e, axis=-1, keepdims=True)
    o_ref[...] = x * attn[:, :, None]


def _channel_attn_weights_kernel(x_ref, w_ref, b_ref, attn_ref, acc_ref, *,
                                 inv_l, true_l, tl):
    """Fallback pass 1: accumulate per-channel sums across L tiles, then softmax."""
    l_idx = pl.program_id(1)

    @pl.when(l_idx == 0)
    def _():
        acc_ref[...] = jnp.zeros_like(acc_ref)

    x = x_ref[...]                                           # (tb, C, tl)
    # Mask the ragged last L tile so padding/garbage lanes don't pollute the sum.
    lane = l_idx * tl + lax.broadcasted_iota(jnp.int32, x.shape, 2)
    x = jnp.where(lane < true_l, x, 0.0)
    acc_ref[...] += jnp.sum(x, axis=-1)                      # (tb, C)

    @pl.when(l_idx == pl.num_programs(1) - 1)
    def _():
        s = acc_ref[...] * inv_l
        t = jnp.tanh(
            jnp.dot(s, w_ref[...], preferred_element_type=jnp.float32) + b_ref[...]
        )
        t = t - jnp.max(t, axis=-1, keepdims=True)
        e = jnp.exp(t)
        attn_ref[...] = (e / jnp.sum(e, axis=-1, keepdims=True))[:, :, None]


def _channel_scale_kernel(x_ref, attn_ref, o_ref):
    """Fallback pass 2: streaming broadcast-scale of x by the (tb, C, 1) weights."""
    o_ref[...] = x_ref[...] * attn_ref[...]


# ----------------------------------------------------------------------------
# Wrapper
# ----------------------------------------------------------------------------
def _tpu_topology():
    """Best-effort (physical VMEM bytes per core, is_dual_tensorcore)."""
    vmem = 64 << 20          # conservative default (v7x per-TC VMEM)
    dual_tc = False
    try:
        info = pltpu.get_tpu_info()
        vmem = int(getattr(info, "vmem_capacity_bytes", vmem))
    except Exception:
        pass
    try:
        kind = jax.devices()[0].device_kind.lower()
        dual_tc = ("v7" in kind) or ("7x" in kind)
    except Exception:
        pass
    return vmem, dual_tc


def channel_wise_attention(x, w_in, b_in, w_out, b_out, *,
                           tile_budget_bytes=12 << 20):
    """x: (B, C, L); w_in: (H, C); b_in: (H,); w_out: (C, H); b_out: (C,)."""
    x = jnp.asarray(x, jnp.float32)
    B, C, L = x.shape

    # Fold the two linear layers (no nonlinearity between them in the module):
    #   (s @ W_in^T + b_in) @ W_out^T + b_out
    # = s @ (W_in^T @ W_out^T) + (b_in @ W_out^T + b_out)
    w_in_t = jnp.asarray(w_in, jnp.float32).T                # (C, H)
    w_out_t = jnp.asarray(w_out, jnp.float32).T              # (H, C)
    w_comb = w_in_t @ w_out_t                                # (C, C)
    b_comb = (jnp.asarray(b_in, jnp.float32) @ w_out_t
              + jnp.asarray(b_out, jnp.float32)).reshape(1, C)
    weight_bytes = (C * C + C) * 4

    vmem_phys, dual_tc = _tpu_topology()
    vmem_cap = max(32 << 20, vmem_phys - (16 << 20))          # headroom below physical
    # 4 live x-sized buffers (double-buffered in + out) must fit below the cap.
    eff_budget = max(1, min(int(tile_budget_bytes), (vmem_cap - (4 << 20)) // 4))

    row_bytes = C * L * 4
    inv_l = 1.0 / L

    # ------------------------------------------------------------------ fused
    if row_bytes <= eff_budget:
        tb = max(1, min(B, eff_budget // row_bytes))
        if dual_tc and B >= 2:
            # Dual-TC (v7x): keep >= ~3 grid steps per core so per-core
            # double-buffering still overlaps DMA with compute.
            min_steps = min(B, 6)
            tb = max(1, min(tb, B // min_steps))
        grid = (pl.cdiv(B, tb),)

        tile_bytes = tb * row_bytes
        vmem_limit = int(min(vmem_cap,
                             max(32 << 20, 4 * tile_bytes + 4 * weight_bytes + (2 << 20))))
        cost = pl.CostEstimate(
            flops=int(B * C * L + 2 * B * C * C),
            transcendentals=int(2 * B * C),
            bytes_accessed=int(2 * B * C * L * 4 + weight_bytes),
        )

        return pl.pallas_call(
            functools.partial(_channel_attn_fused_kernel, inv_l=inv_l),
            out_shape=jax.ShapeDtypeStruct((B, C, L), jnp.float32),
            grid_spec=pltpu.PrefetchScalarGridSpec(
                num_scalar_prefetch=0,
                grid=grid,
                in_specs=[
                    pl.BlockSpec((tb, C, L), lambda b: (b, 0, 0)),   # x batch tile
                    pl.BlockSpec((C, C), lambda b: (0, 0)),          # folded weights
                    pl.BlockSpec((1, C), lambda b: (0, 0)),          # folded bias
                ],
                out_specs=pl.BlockSpec((tb, C, L), lambda b: (b, 0, 0)),
            ),
            compiler_params=pltpu.CompilerParams(
                dimension_semantics=("parallel",),
                vmem_limit_bytes=vmem_limit,
            ),
            cost_estimate=cost,
        )(x, w_comb, b_comb)

    # --------------------------------------------------------------- fallback
    # A single (1, C, L) slab does not fit the VMEM budget: tile L on the grid.
    # Pass 1 computes the (B, C, 1) attention weights; pass 2 streams the scale.
    # TODO(synk): extreme case (huge C with small L) would additionally need a
    # channel-tiling axis; not implemented.
    tb = 1
    if L >= 128:
        tl = max(128, (eff_budget // max(1, tb * C * 4)) // 128 * 128)
        tl = min(tl, max(128, (L // 128) * 128))
    else:
        tl = L
    nb = pl.cdiv(B, tb)
    nl = pl.cdiv(L, tl)

    tile_bytes = tb * C * tl * 4
    vmem_limit_a = int(min(vmem_cap,
                           max(32 << 20, 2 * tile_bytes + 4 * weight_bytes + (2 << 20))))
    vmem_limit_b = int(min(vmem_cap, max(32 << 20, 4 * tile_bytes + (2 << 20))))

    attn = pl.pallas_call(
        functools.partial(_channel_attn_weights_kernel,
                          inv_l=inv_l, true_l=L, tl=tl),
        out_shape=jax.ShapeDtypeStruct((B, C, 1), jnp.float32),
        grid_spec=pltpu.PrefetchScalarGridSpec(
            num_scalar_prefetch=0,
            grid=(nb, nl),
            in_specs=[
                pl.BlockSpec((tb, C, tl), lambda b, l: (b, 0, l)),
                pl.BlockSpec((C, C), lambda b, l: (0, 0)),
                pl.BlockSpec((1, C), lambda b, l: (0, 0)),
            ],
            out_specs=pl.BlockSpec((tb, C, 1), lambda b, l: (b, 0, 0)),
            scratch_shapes=[pltpu.VMEM((tb, C), jnp.float32)],
        ),
        compiler_params=pltpu.CompilerParams(
            dimension_semantics=("parallel", "arbitrary"),
            vmem_limit_bytes=vmem_limit_a,
        ),
        cost_estimate=pl.CostEstimate(
            flops=int(B * C * L + 2 * B * C * C),
            transcendentals=int(2 * B * C),
            bytes_accessed=int(B * C * L * 4 + weight_bytes + B * C * 4),
        ),
    )(x, w_comb, b_comb)

    out = pl.pallas_call(
        _channel_scale_kernel,
        out_shape=jax.ShapeDtypeStruct((B, C, L), jnp.float32),
        grid_spec=pltpu.PrefetchScalarGridSpec(
            num_scalar_prefetch=0,
            grid=(nb, nl),
            in_specs=[
                pl.BlockSpec((tb, C, tl), lambda b, l: (b, 0, l)),
                pl.BlockSpec((tb, C, 1), lambda b, l: (b, 0, 0)),
            ],
            out_specs=pl.BlockSpec((tb, C, tl), lambda b, l: (b, 0, l)),
        ),
        compiler_params=pltpu.CompilerParams(
            dimension_semantics=("parallel", "parallel"),
            vmem_limit_bytes=vmem_limit_b,
        ),
        cost_estimate=pl.CostEstimate(
            flops=int(B * C * L),
            transcendentals=0,
            bytes_accessed=int(2 * B * C * L * 4 + B * C * 4),
        ),
    )(x, attn)
    return out


# ----------------------------------------------------------------------------
# Reference + self-test
# ----------------------------------------------------------------------------
def _reference(x, w_in, b_in, w_out, b_out):
    s = jnp.mean(x, axis=-1)                      # (B, C)
    s = s @ w_in.T + b_in                         # (B, H)
    s = jnp.tanh(s @ w_out.T + b_out)             # (B, C)
    attn = jax.nn.softmax(s, axis=-1)             # (B, C)
    return x * attn[:, :, None]


def _make_params(key, C, H):
    kw1, kb1, kw2, kb2 = jax.random.split(key, 4)
    bound_in = 1.0 / (C ** 0.5)
    bound_out = 1.0 / (H ** 0.5)
    w_in = jax.random.uniform(kw1, (H, C), jnp.float32, -bound_in, bound_in)
    b_in = jax.random.uniform(kb1, (H,), jnp.float32, -bound_in, bound_in)
    w_out = jax.random.uniform(kw2, (C, H), jnp.float32, -bound_out, bound_out)
    b_out = jax.random.uniform(kb2, (C,), jnp.float32, -bound_out, bound_out)
    return w_in, b_in, w_out, b_out


if __name__ == "__main__":
    key = jax.random.PRNGKey(0)
    k1, k2, kp1, kp2 = jax.random.split(key, 4)

    # --- Test 1: fused single-kernel path (L not a multiple of 128) ----------
    B, C, L, HID = 4, 8, 200, 16
    x = jax.random.normal(k1, (B, C, L), dtype=jnp.float32)
    w_in, b_in, w_out, b_out = _make_params(kp1, C, HID)

    out = channel_wise_attention(x, w_in, b_in, w_out, b_out)
    out = jax.block_until_ready(out)
    ref = _reference(x, w_in, b_in, w_out, b_out)
    assert out.shape == (B, C, L)
    assert jnp.allclose(out, ref, atol=1e-5, rtol=1e-4), "fused path mismatch"

    # --- Test 2: fallback L-tiled two-pass path (tiny tile budget forces it) -
    B2, C2, L2, HID2 = 2, 8, 700, 16
    x2 = jax.random.normal(k2, (B2, C2, L2), dtype=jnp.float32)
    w_in2, b_in2, w_out2, b_out2 = _make_params(kp2, C2, HID2)

    out2 = channel_wise_attention(x2, w_in2, b_in2, w_out2, b_out2,
                                  tile_budget_bytes=16 * 1024)
    out2 = jax.block_until_ready(out2)
    ref2 = _reference(x2, w_in2, b_in2, w_out2, b_out2)
    assert out2.shape == (B2, C2, L2)
    assert jnp.allclose(out2, ref2, atol=1e-5, rtol=1e-4), "fallback path mismatch"

    print("KERNEL_OK")
</pallas_src>

<mosaic_0001>
module attributes {stable_mosaic.version = 11 : i64} {
  func.func @_channel_attn_fused_kernel(%arg0: i32, %arg1: memref<4x8x200xf32, #tpu.memory_space<vmem>>, %arg2: memref<8x8xf32, #tpu.memory_space<vmem>>, %arg3: memref<1x8xf32, #tpu.memory_space<vmem>>, %arg4: memref<4x8x200xf32, #tpu.memory_space<vmem>>) attributes {dimension_semantics = [#tpu.dimension_semantics<parallel>], iteration_bounds = array<i64: 1>, scalar_prefetch = 0 : i64, scratch_operands = 0 : i64, tpu.core_type = #tpu.core_type<tc>, window_params = [{transform_indices = @transform_0, window_bounds = array<i64: 4, 8, 200>}, {pipeline_mode = #tpu.pipeline_mode<synchronous>, transform_indices = @transform_1, window_bounds = array<i64: 8, 8>}, {pipeline_mode = #tpu.pipeline_mode<synchronous>, transform_indices = @transform_2, window_bounds = array<i64: 1, 8>}, {transform_indices = @transform_3, window_bounds = array<i64: 4, 8, 200>}]} {
    %c0 = arith.constant 0 : index
    %c0_0 = arith.constant 0 : index
    %c0_1 = arith.constant 0 : index
    %0 = vector.load %arg1[%c0, %c0_0, %c0_1] : memref<4x8x200xf32, #tpu.memory_space<vmem>>, vector<4x8x200xf32>
    %cst = arith.constant dense<0.000000e+00> : vector<4x8xf32>
    %1 = vector.multi_reduction <add>, %0, %cst [2] : vector<4x8x200xf32> to vector<4x8xf32>
    %cst_2 = arith.constant 5.000000e-03 : f32
    %2 = vector.broadcast %cst_2 : f32 to vector<4x8xf32>
    %3 = arith.mulf %1, %2 : vector<4x8xf32>
    %c0_3 = arith.constant 0 : index
    %c0_4 = arith.constant 0 : index
    %4 = vector.load %arg2[%c0_3, %c0_4] : memref<8x8xf32, #tpu.memory_space<vmem>>, vector<8x8xf32>
    %cst_5 = arith.constant dense<0.000000e+00> : vector<4x8xf32>
    %5 = tpu.matmul %3, %4, %cst_5 {dimension_numbers = #tpu.dot_dimension_numbers<[1], [0], [0], [1], [0, 0, 1, 1], [], []>} : vector<4x8xf32>, vector<8x8xf32>, vector<4x8xf32> -> vector<4x8xf32>
    %c0_6 = arith.constant 0 : index
    %c0_7 = arith.constant 0 : index
    %6 = vector.load %arg3[%c0_6, %c0_7] : memref<1x8xf32, #tpu.memory_space<vmem>>, vector<1x8xf32>
    %7 = vector.broadcast %6 : vector<1x8xf32> to vector<4x8xf32>
    %8 = arith.addf %5, %7 : vector<4x8xf32>
    %9 = math.tanh %8 : vector<4x8xf32>
    %cst_8 = arith.constant dense<0xFF800000> : vector<4xf32>
    %10 = vector.multi_reduction <maximumf>, %9, %cst_8 [1] : vector<4x8xf32> to vector<4xf32>
    %11 = vector.shape_cast %10 : vector<4xf32> to vector<4x1xf32>
    %12 = vector.broadcast %11 : vector<4x1xf32> to vector<4x8xf32>
    %13 = arith.subf %9, %12 : vector<4x8xf32>
    %14 = math.exp %13 : vector<4x8xf32>
    %cst_9 = arith.constant dense<0.000000e+00> : vector<4xf32>
    %15 = vector.multi_reduction <add>, %14, %cst_9 [1] : vector<4x8xf32> to vector<4xf32>
    %16 = vector.shape_cast %15 : vector<4xf32> to vector<4x1xf32>
    %17 = vector.broadcast %16 : vector<4x1xf32> to vector<4x8xf32>
    %18 = arith.divf %14, %17 : vector<4x8xf32>
    %19 = vector.shape_cast %18 : vector<4x8xf32> to vector<4x8x1xf32>
    %20 = vector.broadcast %19 : vector<4x8x1xf32> to vector<4x8x200xf32>
    %21 = arith.mulf %0, %20 : vector<4x8x200xf32>
    %c0_10 = arith.constant 0 : index
    %c0_11 = arith.constant 0 : index
    %c0_12 = arith.constant 0 : index
    %22 = vector.load %arg4[%c0_10, %c0_11, %c0_12] : memref<4x8x200xf32, #tpu.memory_space<vmem>>, vector<4x8x200xf32>
    tpu.vector_store %arg4[%c0_10, %c0_11, %c0_12], %21 {strides = array<i32>} : memref<4x8x200xf32, #tpu.memory_space<vmem>>, vector<4x8x200xf32>,
    return
  }
  func.func @transform_0(%arg0: i32) -> (i32, i32, i32) {
    %c0_i32 = arith.constant 0 : i32
    %c0_i32_0 = arith.constant 0 : i32
    %c0_i32_1 = arith.constant 0 : i32
    return %arg0, %c0_i32, %c0_i32_0 : i32, i32, i32
  }
  func.func @transform_1(%arg0: i32) -> (i32, i32) {
    %c0_i32 = arith.constant 0 : i32
    %c0_i32_0 = arith.constant 0 : i32
    %c0_i32_1 = arith.constant 0 : i32
    return %c0_i32, %c0_i32_0 : i32, i32
  }
  func.func @transform_2(%arg0: i32) -> (i32, i32) {
    %c0_i32 = arith.constant 0 : i32
    %c0_i32_0 = arith.constant 0 : i32
    %c0_i32_1 = arith.constant 0 : i32
    return %c0_i32, %c0_i32_0 : i32, i32
  }
  func.func @transform_3(%arg0: i32) -> (i32, i32, i32) {
    %c0_i32 = arith.constant 0 : i32
    %c0_i32_0 = arith.constant 0 : i32
    %c0_i32_1 = arith.constant 0 : i32
    return %arg0, %c0_i32, %c0_i32_0 : i32, i32, i32
  }
}

</mosaic_0001>

<bundles_post_ra>
// kernel: tpu_custom_call.1
= control target key start
LH: loop header
LB: loop body
LE: loop exit
PB: predicated region body
PF: predicated region fallthrough
CT: control target
= control target key end

     0   :  { %8 = vsyncpa [#allocation3], 0  ;;  %s427_s0 = inlined_call_operand.hbm [shape: f32[4,8,200], index: 0, kind: input, shape index: {}]   ;;  %s428_s1 = inlined_call_operand.hbm [shape: f32[8,8], index: 1, kind: input, shape index: {}]   ;;  %s429_s2 = inlined_call_operand.vmem [shape: f32[1,8], index: 2, kind: input, shape index: {}]   ;;  %s430_s3 = inlined_call_operand.hbm [shape: f32[4,8,200], index: 3, kind: output, shape index: {}]  }
   0x1   :  { %9 = vsyncpa [#allocation6], 0 }
   0x2   :  { %10 = vsyncpa [#allocation4], 0  ;;  %s342_s12 = smov [#allocation2]  }
   0x3   :  { %s16_s13 = sshll.u32 %s342_s12, 4  ;;  %s17_s13 = int_to_ptr.vmem [resolvable:$true] %s16_s13 }
   0x4   :  { %s284_s14 = scalar_lea.vmem %s17_s13, 1024  ;;  %p289_p1 = scmp.lt.s32.totalorder %s17_s13, %s17_s13 }
   0x5   :  { %p285_p0 = scmp.ne.s32.totalorder %s17_s13, %s284_s14  ;;  %p290_p2 = scmp.lt.s32.totalorder %s284_s14, %s284_s14 }
   0x7   :  { %p291_p3 = por %p290_p2, %p289_p1 }
   0x9   :  { %p292_p4 = pnand %p291_p3, %p285_p0 }
   0xb   :  { %295 = shalt.err (!%p292_p4)
}
   0xc   :  { %s343_s15 = smov 256   ;;  %s344_s16 = smov 16  }
   0xd   :  { %22 = dma.hbm_to_vmem [thread:$0]  %s427_s0, 1024, %s17_s13, [#allocation3], %s343_s15, %s343_s15, %s344_s16  }
   0xe   :  { %s345_s19 = smov [#allocation5]  }
   0xf   :  { %s29_s20 = sshll.u32 %s345_s19, 4  ;;  %s30_s20 = int_to_ptr.vmem [resolvable:$true] %s29_s20 }
  0x10   :  { %s304_s21 = scalar_lea.vmem %s30_s20, 128  ;;  %p309_p6 = scmp.lt.s32.totalorder %s30_s20, %s30_s20 }
  0x11   :  { %p305_p5 = scmp.ne.s32.totalorder %s30_s20, %s304_s21  ;;  %p310_p7 = scmp.lt.s32.totalorder %s304_s21, %s304_s21 }
  0x13   :  { %p311_p8 = por %p310_p7, %p309_p6 }
  0x15   :  { %p312_p9 = pnand %p311_p8, %p305_p5 }
  0x17   :  { %315 = shalt.err (!%p312_p9)
}
  0x18   :  { %32 = dma.hbm_to_vmem [thread:$0]  %s428_s1, 128, %s30_s20, [#allocation6]  }
  0x19   :  { %336 = dma.done.wait [#allocation3], 1024  }
  0x1a   :  { %337 = vsyncadd [#allocation3], 4294966272 }
  0x1b   :  { %338 = dma.done.wait [#allocation6], 128  }
  0x1c   :  { %339 = vsyncadd [#allocation6], 4294967168  ;;  %vm49_vm0 = vcmask 588800   ;;  %v378_v0 = vld [vmem:[#allocation2] sm:$0xff]  ;;  %v380_v1 = vld [vmem:[#allocation2 + $0x8] sm:$0xff]  ;;  %v346_v17 = vmov 0.0   ;;  %v82_v18 = vlaneseq }
  0x1d   :  { %v382_v2 = vld [vmem:[#allocation2 + $0x20] sm:$0xff]  ;;  %v50_v3 = vsel %vm49_vm0, %v380_v1, 0.0  ;;  %v386_v4 = vld [vmem:[#allocation2 + $0x28] sm:$0xff]  ;;  %v388_v5 = vld [vmem:[#allocation2 + $0x10] sm:$0xff]  ;;  %258 = vmatprep.subr.mxu0 %v346_v17  ;;  %vm347_vm1 = vmmov 0   ;;  %vm100_vm2 = vcmask 1041409  }
  0x1e   :  { %v390_v6 = vld [vmem:[#allocation2 + $0x18] sm:$0xff]  ;;  %v51_v7 = vadd.f32 %v50_v3, %v378_v0  ;;  %v58_v8 = vsel %vm49_vm0, %v386_v4, 0.0  ;;  %v397_v10 = vld [vmem:[#allocation2 + $0x30] sm:$0xff]  ;;  %v70_v16 = vld [vmem:[#allocation5] sm:$0xff]  ;;  %260 = vmatprep.mubr.msk.f32.mxu0 %vm347_vm1, %v346_v17  ;;  %v83_v19 = vand.u32 127, %v82_v18  ;;  %v85_v20 = vshrl.u32 %v82_v18, 7 }
  0x1f   :  { %v54_v9 = vsel %vm49_vm0, %v390_v6, 0.0  ;;  %v399_v11 = vld [vmem:[#allocation2 + $0x38] sm:$0xff]  ;;  %v59_v12 = vadd.f32 %v58_v8, %v382_v2  ;;  %259 = vmatpush3.msra.mxu0 %v70_v16  ;;  %vm102_vm3 = vcmask 1042434   ;;  %vm104_vm4 = vcmask 1043459   ;;  %v254_v37 = vld [vmem:[%s429_s2] ss:$0 sm:$0xff] }
  0x20   :  { %v62_v13 = vsel %vm49_vm0, %v399_v11, 0.0  ;;  %52 = vadd.xlane.f32.xlu0 %v51_v7  ;;  %v55_v14 = vadd.f32 %v54_v9, %v388_v5  ;;  %v86_v23 = vsub.s32 %v83_v19, %v85_v20  ;;  %vm106_vm5 = vcmask 64512   ;;  %s348_s2 = smov [#allocation7]  }
  0x21   :  { %60 = vadd.xlane.f32.xlu1 %v59_v12  ;;  %v63_v15 = vadd.f32 %v62_v13, %v397_v10  ;;  %vm180_vm6 = vcmask 60416   ;;  %v201_v49 = vsub.s32 1, %v85_v20  ;;  %v194_v50 = vsub.s32 0, %v85_v20  ;;  %s241_s24 = sshll.u32 %s348_s2, 4  ;;  %s242_s24 = int_to_ptr.vmem [resolvable:$true] %s241_s24 }
  0x22   :  { %v208_v55 = vsub.s32 2, %v85_v20  ;;  %v215_v57 = vsub.s32 3, %v85_v20  ;;  %s316_s25 = scalar_lea.vmem %s242_s24, 1024  ;;  %p321_p11 = scmp.lt.s32.totalorder %s242_s24, %s242_s24 }
  0x23   :  { %p317_p10 = scmp.ne.s32.totalorder %s242_s24, %s316_s25  ;;  %p322_p12 = scmp.lt.s32.totalorder %s316_s25, %s316_s25 }
  0x24   :  { %56 = vadd.xlane.f32.xlu0 %v55_v14 }
  0x25   :  { %64 = vadd.xlane.f32.xlu1 %v63_v15  ;;  %p323_p13 = por %p322_p12, %p321_p11 }
  0x27   :  { %p324_p0 = pnand %p323_p13, %p317_p10 }
  0xa9   :  { %v53_v21 = vpop.xlane.xlu0 %52 }
  0xaa   :  { %v61_v22 = vpop.xlane.xlu1 %60  ;;  %v66_v24 = vmul.f32 0.005, %v53_v21 }
  0xab   :  { %v68_v25 = vmul.f32 0.005, %v61_v22 }
  0xac   :  { %v87_v30 = vrot.slane %v66_v24, %v86_v23 }
  0xad   :  { %v57_v26 = vpop.xlane.xlu0 %56  ;;  %v95_v32 = vrot.slane %v68_v25, %v86_v23 }
  0xae   :  { %v67_v27 = vmul.f32 0.005, %v57_v26  ;;  %v65_v28 = vpop.xlane.xlu1 %64 }
  0xaf   :  { %v69_v29 = vmul.f32 0.005, %v65_v28 }
  0xb0   :  { %v91_v31 = vrot.slane %v67_v27, %v86_v23 }
  0xb1   :  { %v99_v33 = vrot.slane %v69_v29, %v86_v23 }
  0xb2   :  { %v101_v34 = vsel %vm100_vm2, %v91_v31, %v87_v30 }
  0xb3   :  { %v103_v35 = vsel %vm102_vm3, %v95_v32, %v101_v34 }
  0xb4   :  { %v105_v36 = vsel %vm104_vm4, %v99_v33, %v103_v35 }
  0xb5   :  { %261 = vmatmul.mubr.msk.f32.vlgmr.msra.gmra.mxu0 %vm106_vm5, %v105_v36 }
 0x175   :  { %v175_v38 = vpop.f32.mrf.mxu0 }
 0x176   :  { %v176_v39 = vadd.f32 %v254_v37, %v175_v38 }
 0x177   :  { %v262_v40 = vpop.f32.mrf.mxu0 }
 0x178   :  { %270 = vtanh.f32 %v176_v39 }
 0x185   :  { %v271_v41 = vpop.eup %270 }
 0x186   :  { %v181_v42 = vsel %vm180_vm6, %v271_v41, -inf }
 0x187   :  { %182 = vmax.xlane.f32.xlu0 %v181_v42 }
 0x210   :  { %v183_v43 = vpop.xlane.xlu0 %182 }
 0x211   :  { %v184_v44 = vsub.f32 %v271_v41, %v183_v43 }
 0x213   :  { %v185_v45 = vmul.f32 1.442695, %v184_v44 }
 0x215   :  { %272 = vpow2.f32 %v185_v45 }
 0x222   :  { %v273_v46 = vpop.eup %272 }
 0x223   :  { %v187_v47 = vsel %vm180_vm6, %v273_v46, 0.0 }
 0x224   :  { %188 = vadd.xlane.f32.xlu1 %v187_v47 }
 0x2ad   :  { %v189_v48 = vpop.xlane.xlu1 %188 }
 0x2ae   :  { %274 = vrcp.f32 %v189_v48 }
 0x2bb   :  { %v275_v51 = vpop.eup %274 }
 0x2bc   :  { %v191_v52 = vmul.f32 %v275_v51, %v273_v46 }
 0x2be   :  { %v202_v53 = vrot.slane %v191_v52, %v201_v49  ;;  %v195_v54 = vrot.slane %v191_v52, %v194_v50  ;;  %v209_v56 = vrot.slane %v191_v52, %v208_v55  ;;  %v216_v58 = vrot.slane %v191_v52, %v215_v57 }
 0x2c0   :  { %204 = vbcast.lane.b32.xlu1 %v202_v53, 256  ;;  %197 = vbcast.lane.b32.xlu0 %v195_v54, 256 }
 0x2c4   :  { %211 = vbcast.lane.b32.xlu1 %v209_v56, 256 }
 0x2c8   :  { %218 = vbcast.lane.b32.xlu1 %v216_v58, 256 }
 0x332   :  { %v205_v59 = vpop.permute.xlu1 %204  ;;  %v198_v60 = vpop.permute.xlu0 %197 }
 0x333   :  { %v222_v61 = vmul.f32 %v205_v59, %v388_v5  ;;  %v223_v62 = vmul.f32 %v205_v59, %v390_v6  ;;  %v220_v63 = vmul.f32 %v198_v60, %v378_v0  ;;  %v221_v3 = vmul.f32 %v198_v60, %v380_v1 }
 0x335   :  { %230 = vst [vmem:[#allocation7 + $0x10] sm:$0xff] %v222_v61  ;;  %231 = vst.msk [vmem:[#allocation7 + $0x18] sm:$0xff] %vm49_vm0, %v223_v62 }
 0x336   :  { %228 = vst [vmem:[#allocation7] sm:$0xff] %v220_v63  ;;  %229 = vst.msk [vmem:[#allocation7 + $0x8] sm:$0xff] %vm49_vm0, %v221_v3  ;;  %v212_v7 = vpop.permute.xlu1 %211 }
 0x337   :  { %v224_v8 = vmul.f32 %v212_v7, %v382_v2  ;;  %v225_v9 = vmul.f32 %v212_v7, %v386_v4 }
 0x339   :  { %232 = vst [vmem:[#allocation7 + $0x20] sm:$0xff] %v224_v8  ;;  %233 = vst.msk [vmem:[#allocation7 + $0x28] sm:$0xff] %vm49_vm0, %v225_v9 }
 0x33a   :  { %v219_v5 = vpop.permute.xlu1 %218 }
 0x33b   :  { %v226_v0 = vmul.f32 %v219_v5, %v397_v10  ;;  %v227_v1 = vmul.f32 %v219_v5, %v399_v11 }
 0x33d   :  { %234 = vst [vmem:[#allocation7 + $0x30] sm:$0xff] %v226_v0  ;;  %235 = vst.msk [vmem:[#allocation7 + $0x38] sm:$0xff] %vm49_vm0, %v227_v1 }
 0x33e   :  { %327 = shalt.err (!%p324_p0)
}
 0x33f   :  { %247 = dma.vmem_to_hbm [thread:$0]  %s242_s24, 1024, %s430_s3, [#allocation4], %s343_s15, %s343_s15, %s344_s16  }
 0x340   :  { %340 = dma.done.wait [#allocation4], 1024  }
 0x341   :  { %341 = vsyncadd [#allocation4], 4294966272 }
 0x342   :  { %251 = vsyncpa [#allocation3], 1 }
 0x343   :  { %252 = vsyncpa [#allocation6], 1 }
 0x344   :  { %253 = vsyncpa [#allocation4], 1 }

</bundles_post_ra>
